<compile_context>
chip_gen: v7x
topology: tpu7x:2x2x1
jax: 0.10.0
libtpu: 0.0.40
codegen_flags: <defaults>
</compile_context>

<pallas_src>
import functools
import math

import jax
import jax.numpy as jnp
import numpy as np
from jax import lax
from jax.experimental import pallas as pl
from jax.experimental.pallas import tpu as pltpu

_INV_SQRT2 = 1.0 / math.sqrt(2.0)
_MIB = 1024 * 1024


def _videomae_head_kernel(x_ref, w_ref, b_ref, o_ref, acc_ref, *, inv_s, tile_s, s_tail):
    # x_ref:   (TILE_B, TILE_S, H)  streamed block of last_hidden_state (bf16 or f32)
    # w_ref:   (H, E_pad)           fused (adaptive-pool @ linear.T) weight, VMEM-resident
    # b_ref:   (1, E_pad)           linear bias, VMEM-resident
    # o_ref:   (TILE_B, E_pad)      output block (resident across the reduction axis)
    # acc_ref: (TILE_B, 8, H) f32   running per-sublane-group partial sum over S
    s = pl.program_id(1)
    ns = pl.num_programs(1)

    @pl.when(s == 0)
    def _():
        acc_ref[...] = jnp.zeros_like(acc_ref)

    xb = x_ref[...].astype(jnp.float32)          # bf16/f32 stream, f32 accumulation
    if s_tail:                                    # static: last S block is partial -> mask it
        limit = jnp.where(s == ns - 1, s_tail, tile_s)
        pos = lax.broadcasted_iota(jnp.int32, xb.shape, dimension=1)
        xb = jnp.where(pos < limit, xb, 0.0)

    tb, _, h = xb.shape
    # Pure vreg-wise VALU accumulation (no per-step cross-sublane reduce): fold tile_s into
    # groups of 8 sublanes; the single sublane collapse happens once in the finalize branch.
    acc_ref[...] += xb.reshape(tb, tile_s // 8, 8, h).sum(axis=1)

    @pl.when(s == ns - 1)
    def _():
        pooled = acc_ref[...].sum(axis=1) * inv_s                        # mean over S, (TILE_B, H)
        hfin = jnp.dot(pooled, w_ref[...],
                       preferred_element_type=jnp.float32) + b_ref[...]  # fused pool + Linear
        # exact GELU (torch.nn.GELU default): 0.5 * x * (1 + erf(x / sqrt(2)))
        o_ref[...] = (0.5 * hfin * (1.0 + lax.erf(hfin * _INV_SQRT2))).astype(o_ref.dtype)


def _adaptive_pool_matrix(h_in, w_out):
    """(h_in, w_out) matrix P such that X @ P == AdaptiveAvgPool over the last axis."""
    p = np.zeros((h_in, w_out), np.float32)
    for j in range(w_out):
        start = (j * h_in) // w_out
        end = -((-(j + 1) * h_in) // w_out)      # ceil((j+1)*h_in / w_out)
        p[start:end, j] = 1.0 / (end - start)
    return p


def _round_up(x, m):
    return ((x + m - 1) // m) * m


def _vmem_capacity_bytes():
    try:
        return int(pltpu.get_tpu_info().vmem_capacity_bytes)
    except Exception:
        return 64 * _MIB          # conservative default = v7x per-TensorCore VMEM


@functools.partial(jax.jit, static_argnames=(
    "word_embedding_dim", "e_out", "e_pad", "tile_b", "tile_s", "s_tail", "vmem_limit"))
def _videomae_head(last_hidden_state, w_linear, b_linear, *, word_embedding_dim,
                   e_out, e_pad, tile_b, tile_s, s_tail, vmem_limit):
    B, S, H = last_hidden_state.shape

    # Fold AdaptiveAvgPool2d's last-dim pooling with the Linear weight into one (H, E_pad) matrix.
    pool_mat = jnp.asarray(_adaptive_pool_matrix(H, word_embedding_dim))
    w_fused = jnp.dot(pool_mat, w_linear.T.astype(jnp.float32))
    bias = b_linear.astype(jnp.float32)
    if e_pad != e_out:            # keep the epilogue store lane-dense (multiple of 128)
        w_fused = jnp.pad(w_fused, ((0, 0), (0, e_pad - e_out)))
        bias = jnp.pad(bias, (0, e_pad - e_out))
    bias = bias.reshape(1, e_pad)

    grid = (B // tile_b, pl.cdiv(S, tile_s))
    kernel = functools.partial(_videomae_head_kernel,
                               inv_s=1.0 / float(S), tile_s=tile_s, s_tail=s_tail)

    itemsize = jnp.dtype(last_hidden_state.dtype).itemsize
    cost = pl.CostEstimate(
        flops=2 * B * S * H + 2 * B * H * e_pad,
        transcendentals=B * e_pad,
        bytes_accessed=B * S * H * itemsize + (H * e_pad + e_pad + B * e_pad) * 4,
    )

    out = pl.pallas_call(
        kernel,
        out_shape=jax.ShapeDtypeStruct((B, e_pad), jnp.float32),
        grid_spec=pltpu.PrefetchScalarGridSpec(
            num_scalar_prefetch=0,
            grid=grid,
            in_specs=[
                pl.BlockSpec((tile_b, tile_s, H), lambda b, s: (b, s, 0)),   # streamed activations
                pl.BlockSpec((H, e_pad), lambda b, s: (0, 0)),               # resident fused weight
                pl.BlockSpec((1, e_pad), lambda b, s: (0, 0)),               # resident bias
            ],
            out_specs=pl.BlockSpec((tile_b, e_pad), lambda b, s: (b, 0)),
            scratch_shapes=[pltpu.VMEM((tile_b, 8, H), jnp.float32)],
        ),
        compiler_params=pltpu.CompilerParams(
            dimension_semantics=("parallel", "arbitrary"),
            vmem_limit_bytes=vmem_limit),
        cost_estimate=cost,
    )(last_hidden_state, w_fused, bias)

    return out[:, :e_out] if e_pad != e_out else out


def videomae_encoder(last_hidden_state, w_linear, b_linear, *, word_embedding_dim,
                     tile_b=None, tile_s=None):
    """last_hidden_state: (B, S, H) bf16/f32 output of the external VideoMAE backbone.
       w_linear: (E, word_embedding_dim) torch-layout Linear weight; b_linear: (E,)."""
    B, S, H = last_hidden_state.shape
    E = w_linear.shape[0]
    e_pad = _round_up(E, 128)
    itemsize = jnp.dtype(last_hidden_state.dtype).itemsize

    if tile_b is None:
        # Multiple-of-8 batch tile (sublane-friendly output block); tile_b=8 keeps >= 2
        # "parallel" batch blocks whenever B >= 16 so both v7x TensorCores get work.
        tile_b = 8 if B % 8 == 0 else B
    assert B % tile_b == 0, "tile_b must divide the batch (otherwise rows would be dropped)"

    vmem_cap = _vmem_capacity_bytes()
    # Generation-aware activation block: ~8 MiB/buffer on 128-MiB-VMEM v5e/v6e,
    # ~6.4 MiB/buffer on 64-MiB v7x; double-buffered by the BlockSpec pipeline.
    per_buf_cap = min(8 * _MIB, vmem_cap // 10)

    if tile_s is None:
        cap_rows = max(8, (per_buf_cap // (tile_b * H * itemsize)) // 8 * 8)
        tile_s = min(_round_up(S, 8), cap_rows)
    else:
        tile_s = max(8, _round_up(tile_s, 8))     # kernel accumulates in sublane groups of 8
    grid_s = pl.cdiv(S, tile_s)
    s_tail = S - (grid_s - 1) * tile_s            # valid rows in the last (possibly partial) block
    s_tail = 0 if s_tail == tile_s else s_tail    # 0 => no masking needed

    # Scoped-VMEM limit: 2x-buffered activations + 2x-buffered weight/bias/out + accumulator,
    # plus headroom for compiler-internal scratch; never below a 32-MiB floor, never >= physical.
    needed = (2 * tile_b * tile_s * H * itemsize
              + 2 * (H * e_pad + 8 * e_pad + max(tile_b, 8) * e_pad) * 4
              + tile_b * 8 * H * 4)
    vmem_limit = max(needed + 8 * _MIB, 32 * _MIB)
    vmem_limit = min(vmem_limit, vmem_cap - 4 * _MIB)
    vmem_limit = max(vmem_limit, needed + 1 * _MIB)

    return _videomae_head(last_hidden_state, w_linear, b_linear,
                          word_embedding_dim=word_embedding_dim,
                          e_out=E, e_pad=e_pad, tile_b=tile_b, tile_s=tile_s,
                          s_tail=s_tail, vmem_limit=int(vmem_limit))


def _reference(last_hidden_state, w_linear, b_linear, word_embedding_dim):
    # Pure-JAX reference of the module head for a sanity check.
    x = last_hidden_state.astype(jnp.float32)
    H = x.shape[-1]
    pool_mat = jnp.asarray(_adaptive_pool_matrix(H, word_embedding_dim))
    pooled = jnp.mean(x, axis=1) @ pool_mat
    h = pooled @ w_linear.T.astype(jnp.float32) + b_linear.astype(jnp.float32)
    return 0.5 * h * (1.0 + lax.erf(h * _INV_SQRT2))


if __name__ == "__main__":
    key = jax.random.PRNGKey(0)
    k_hidden, k_w, k_h2 = jax.random.split(key, 3)

    # Small shapes consistent with the module's forward:
    #   last_hidden_state (backbone output): batch=2, seq=16, hidden=32
    #   word_embedding_dim=32, embedding_dim=32
    B, S, H = 2, 16, 32
    WORD_DIM, EMBED_DIM = 32, 32

    # Stream the backbone output as bf16 (halves the bandwidth-bound HBM read); accumulation is f32.
    last_hidden_state = jax.random.normal(
        k_hidden, (B, S, H), dtype=jnp.float32).astype(jnp.bfloat16)

    # Linear(word_embedding_dim, embedding_dim): xavier_normal_-style weight, zero bias.
    xavier_std = math.sqrt(2.0 / (WORD_DIM + EMBED_DIM))
    w_linear = jax.random.normal(k_w, (EMBED_DIM, WORD_DIM), dtype=jnp.float32) * xavier_std
    b_linear = jnp.zeros((EMBED_DIM,), dtype=jnp.float32)

    # tile_s=8 -> a 2-step sequence reduction, exercising the accumulator path.
    out = videomae_encoder(last_hidden_state, w_linear, b_linear,
                           word_embedding_dim=WORD_DIM, tile_s=8)
    jax.block_until_ready(out)
    assert out.shape == (B, EMBED_DIM) and out.dtype == jnp.float32
    ref = _reference(last_hidden_state, w_linear, b_linear, WORD_DIM)
    assert jnp.allclose(out, ref, atol=1e-3, rtol=1e-3), float(jnp.max(jnp.abs(out - ref)))

    # Second check: f32 stream with a ragged sequence (S=13) -> masked partial last block.
    x2 = jax.random.normal(k_h2, (B, 13, H), dtype=jnp.float32)
    out2 = videomae_encoder(x2, w_linear, b_linear, word_embedding_dim=WORD_DIM, tile_s=8)
    jax.block_until_ready(out2)
    ref2 = _reference(x2, w_linear, b_linear, WORD_DIM)
    assert jnp.allclose(out2, ref2, atol=1e-3, rtol=1e-3), float(jnp.max(jnp.abs(out2 - ref2)))

    print("KERNEL_OK")
</pallas_src>

<mosaic_0001>
module attributes {stable_mosaic.version = 11 : i64} {
  func.func @_videomae_head_kernel(%arg0: i32, %arg1: i32, %arg2: memref<2x8x32xbf16, #tpu.memory_space<vmem>>, %arg3: memref<32x128xf32, #tpu.memory_space<vmem>>, %arg4: memref<1x128xf32, #tpu.memory_space<vmem>>, %arg5: memref<2x128xf32, #tpu.memory_space<vmem>>, %arg6: memref<2x8x32xf32, #tpu.memory_space<vmem>>) attributes {dimension_semantics = [#tpu.dimension_semantics<parallel>, #tpu.dimension_semantics<arbitrary>], iteration_bounds = array<i64: 1, 2>, scalar_prefetch = 0 : i64, scratch_operands = 1 : i64, tpu.core_type = #tpu.core_type<tc>, window_params = [{transform_indices = @transform_0, window_bounds = array<i64: 2, 8, 32>}, {pipeline_mode = #tpu.pipeline_mode<synchronous>, transform_indices = @transform_1, window_bounds = array<i64: 32, 128>}, {pipeline_mode = #tpu.pipeline_mode<synchronous>, transform_indices = @transform_2, window_bounds = array<i64: 1, 128>}, {transform_indices = @transform_3, window_bounds = array<i64: 2, 128>}]} {
    %c0_i32 = arith.constant 0 : i32
    %0 = arith.cmpi eq, %arg1, %c0_i32 : i32
    %1 = arith.extui %0 : i1 to i32
    %c0_i32_0 = arith.constant 0 : i32
    %2 = arith.cmpi ne, %1, %c0_i32_0 : i32
    scf.if %2 {
      %cst_10 = arith.constant 0.000000e+00 : f32
      %13 = vector.broadcast %cst_10 : f32 to vector<2x8x32xf32>
      %c0_11 = arith.constant 0 : index
      %c0_12 = arith.constant 0 : index
      %c0_13 = arith.constant 0 : index
      %14 = vector.load %arg6[%c0_11, %c0_12, %c0_13] : memref<2x8x32xf32, #tpu.memory_space<vmem>>, vector<2x8x32xf32>
      tpu.vector_store %arg6[%c0_11, %c0_12, %c0_13], %13 {strides = array<i32>} : memref<2x8x32xf32, #tpu.memory_space<vmem>>, vector<2x8x32xf32>,
    } else {
    }
    %c0 = arith.constant 0 : index
    %c0_1 = arith.constant 0 : index
    %c0_2 = arith.constant 0 : index
    %3 = vector.load %arg2[%c0, %c0_1, %c0_2] : memref<2x8x32xbf16, #tpu.memory_space<vmem>>, vector<2x8x32xbf16>
    %4 = arith.extf %3 : vector<2x8x32xbf16> to vector<2x8x32xf32>
    %c0_3 = arith.constant 0 : index
    %c0_4 = arith.constant 0 : index
    %c0_5 = arith.constant 0 : index
    %5 = vector.load %arg6[%c0_3, %c0_4, %c0_5] : memref<2x8x32xf32, #tpu.memory_space<vmem>>, vector<2x8x32xf32>
    %6 = vector.shape_cast %4 : vector<2x8x32xf32> to vector<2x1x8x32xf32>
    %cst = arith.constant dense<0.000000e+00> : vector<2x8x32xf32>
    %7 = vector.multi_reduction <add>, %6, %cst [1] : vector<2x1x8x32xf32> to vector<2x8x32xf32>
    %8 = arith.addf %5, %7 : vector<2x8x32xf32>
    %c0_6 = arith.constant 0 : index
    %c0_7 = arith.constant 0 : index
    %c0_8 = arith.constant 0 : index
    %9 = vector.load %arg6[%c0_6, %c0_7, %c0_8] : memref<2x8x32xf32, #tpu.memory_space<vmem>>, vector<2x8x32xf32>
    tpu.vector_store %arg6[%c0_6, %c0_7, %c0_8], %8 {strides = array<i32>} : memref<2x8x32xf32, #tpu.memory_space<vmem>>, vector<2x8x32xf32>,
    %c1_i32 = arith.constant 1 : i32
    %10 = arith.cmpi eq, %arg1, %c1_i32 : i32
    %11 = arith.extui %10 : i1 to i32
    %c0_i32_9 = arith.constant 0 : i32
    %12 = arith.cmpi ne, %11, %c0_i32_9 : i32
    scf.if %12 {
      %c0_10 = arith.constant 0 : index
      %c0_11 = arith.constant 0 : index
      %c0_12 = arith.constant 0 : index
      %13 = vector.load %arg6[%c0_10, %c0_11, %c0_12] : memref<2x8x32xf32, #tpu.memory_space<vmem>>, vector<2x8x32xf32>
      %cst_13 = arith.constant dense<0.000000e+00> : vector<2x32xf32>
      %14 = vector.multi_reduction <add>, %13, %cst_13 [1] : vector<2x8x32xf32> to vector<2x32xf32>
      %cst_14 = arith.constant 6.250000e-02 : f32
      %15 = vector.broadcast %cst_14 : f32 to vector<2x32xf32>
      %16 = arith.mulf %14, %15 : vector<2x32xf32>
      %c0_15 = arith.constant 0 : index
      %c0_16 = arith.constant 0 : index
      %17 = vector.load %arg3[%c0_15, %c0_16] : memref<32x128xf32, #tpu.memory_space<vmem>>, vector<32x128xf32>
      %cst_17 = arith.constant dense<0.000000e+00> : vector<2x128xf32>
      %18 = tpu.matmul %16, %17, %cst_17 {dimension_numbers = #tpu.dot_dimension_numbers<[1], [0], [0], [1], [0, 0, 1, 1], [], []>} : vector<2x32xf32>, vector<32x128xf32>, vector<2x128xf32> -> vector<2x128xf32>
      %c0_18 = arith.constant 0 : index
      %c0_19 = arith.constant 0 : index
      %19 = vector.load %arg4[%c0_18, %c0_19] : memref<1x128xf32, #tpu.memory_space<vmem>>, vector<1x128xf32>
      %20 = vector.broadcast %19 : vector<1x128xf32> to vector<2x128xf32>
      %21 = arith.addf %18, %20 : vector<2x128xf32>
      %cst_20 = arith.constant 5.000000e-01 : f32
      %22 = vector.broadcast %cst_20 : f32 to vector<2x128xf32>
      %23 = arith.mulf %22, %21 : vector<2x128xf32>
      %cst_21 = arith.constant 0.707106769 : f32
      %24 = vector.broadcast %cst_21 : f32 to vector<2x128xf32>
      %25 = arith.mulf %21, %24 : vector<2x128xf32>
      %26 = math.erf %25 : vector<2x128xf32>
      %cst_22 = arith.constant 1.000000e+00 : f32
      %27 = vector.broadcast %cst_22 : f32 to vector<2x128xf32>
      %28 = arith.addf %27, %26 : vector<2x128xf32>
      %29 = arith.mulf %23, %28 : vector<2x128xf32>
      %c0_23 = arith.constant 0 : index
      %c0_24 = arith.constant 0 : index
      %30 = vector.load %arg5[%c0_23, %c0_24] : memref<2x128xf32, #tpu.memory_space<vmem>>, vector<2x128xf32>
      tpu.vector_store %arg5[%c0_23, %c0_24], %29 {strides = array<i32>} : memref<2x128xf32, #tpu.memory_space<vmem>>, vector<2x128xf32>,
    } else {
    }
    return
  }
  func.func @transform_0(%arg0: i32, %arg1: i32) -> (i32, i32, i32) {
    %c0_i32 = arith.constant 0 : i32
    %c0_i32_0 = arith.constant 0 : i32
    return %arg0, %arg1, %c0_i32 : i32, i32, i32
  }
  func.func @transform_1(%arg0: i32, %arg1: i32) -> (i32, i32) {
    %c0_i32 = arith.constant 0 : i32
    %c0_i32_0 = arith.constant 0 : i32
    %c0_i32_1 = arith.constant 0 : i32
    return %c0_i32, %c0_i32_0 : i32, i32
  }
  func.func @transform_2(%arg0: i32, %arg1: i32) -> (i32, i32) {
    %c0_i32 = arith.constant 0 : i32
    %c0_i32_0 = arith.constant 0 : i32
    %c0_i32_1 = arith.constant 0 : i32
    return %c0_i32, %c0_i32_0 : i32, i32
  }
  func.func @transform_3(%arg0: i32, %arg1: i32) -> (i32, i32) {
    %c0_i32 = arith.constant 0 : i32
    %c0_i32_0 = arith.constant 0 : i32
    return %arg0, %c0_i32 : i32, i32
  }
}

</mosaic_0001>

<bundles_post_ra>
// kernel: _videomae_head.1
= control target key start
LH: loop header
LB: loop body
LE: loop exit
PB: predicated region body
PF: predicated region fallthrough
CT: control target
= control target key end

     0   :  { %8 = vsyncpa [#allocation5], 0  ;;  %s616_s12 = smov 0   ;;  %s618_s13 = smov 0   ;;  %s728_s0 = inlined_call_operand.vmem [shape: bf16[2,16,32], index: 0, kind: input, shape index: {}]   ;;  %s729_s1 = inlined_call_operand.vmem [shape: f32[32,128], index: 1, kind: input, shape index: {}]   ;;  %s730_s2 = inlined_call_operand.vmem [shape: f32[1,128], index: 2, kind: input, shape index: {}]   ;;  %s731_s3 = inlined_call_operand.hbm [shape: f32[2,128], index: 3, kind: output, shape index: {}]  }
   0x1   :  { %s620_s14 = smov 0   ;;  %s622_s15 = smov 0  }
   0x2   :  { %s624_s16 = smov 0  }
   0x3 LB: > { %s427_s17 = sadd.s32 4294967295, %s589_s16   ;;  %s23_s18 = sadd.s32 1, %s585_s15  ;;  %s589_s16 = sphi %s624_s16, %s14_s16   ;;  %s585_s15 = sphi %s622_s15, %s736_s15   ;;  %s581_s14 = sphi %s620_s14, %s735_s14   ;;  %s577_s13 = sphi %s618_s13, %s734_s13   ;;  %s573_s12 = sphi %s616_s12, %s733_s12  }
   0x4   : > { %p24_p0 = scmp.ge.s32.totalorder %s23_s18, 2  ;;  %p42_p1 = scmp.ne.s32.totalorder %s577_s13, %s573_s12 }
   0x5   : > { %p43_p2 = scmp.eq.s32.totalorder %s589_s16, 0  ;;  %s35_s20 = sadd.s32 1, %s577_s13 }
   0x6   : > { %s738_s18 = smov (%p24_p0, %s23_s18), 0  ;;  %p429_p5 = scmp.ge.s32.totalorder %s589_s16, 2 }
   0x7   : > { %p44_p3 = por %p43_p2, %p42_p1  ;;  %s31_s19 = ssub.s32 %s585_s15, %s738_s18 }
   0x8   : > { %p33_p4 = scmp.eq.s32.totalorder %s31_s19, 0  ;;  %142 = sbr.rel (%p429_p5) target bundleno = 22 (0x16), region = 24 }
   0xa   : > { %s652_s21 = scalar_select %p33_p4, %s577_s13, %s35_s20  }
   0xf   : > { %145 = sbr.rel (!%p44_p3) target bundleno = 22 (0x16), region = 28  ;;  %s147_s22 = sand.u32 (%p44_p3), 1, %s577_s13  }
  0x10   : > { %s431_s23 = sshll.u32 (%p44_p3), %s585_s15, 2  ;;  %s430_s24 = sshll.u32 (%p44_p3), %s147_s22, 3 }
  0x11   : > { %s154_s27 = scalar_lea.vmem (%p44_p3), %s728_s0, %s431_s23  ;;  %s149_s28 = scalar_lea.vmem (%p44_p3), [#allocation3], %s430_s24 }
  0x12   : > { %v170_v0 = vld [vmem:[%s154_s27] sm:$0xf] (%p44_p3)  ;;  %v172_v1 = vld [vmem:[%s154_s27 + $0x8] sm:$0xf] (%p44_p3) }
  0x13   : > { %171 = vst [vmem:[%s149_s28] sm:$0xf] (%p44_p3), %v170_v0  ;;  %173 = vst [vmem:[%s149_s28 + $0x4] sm:$0xf] (%p44_p3), %v172_v1 }
  0x16 PF: > { %p432_p6 = scmp.ge.s32.totalorder %s589_s16, 1  ;;  %p199_p7 = scmp.lt.s32.totalorder %s589_s16, 3 }
  0x18   : > { %p200_p8 = pnand %p432_p6, %p199_p7 }
  0x19   : > { %s206_s29 = sand.u32 (!%p200_p8), 1, %s573_s12   ;;  %p434_p9 = scmp.ne.s32.totalorder (!%p200_p8), %s581_s14, 0 }
  0x1a   : > { %203 = sbr.rel (%p200_p8) target bundleno = 326 (0x146), region = 69  ;;  %s433_s30 = sshll.u32 (!%p200_p8), %s206_s29, 3 }
  0x1b   : > { %s208_s4 = scalar_lea.vmem (!%p200_p8), [#allocation3], %s433_s30 }
  0x21   : > { %228 = sbr.rel (%p434_p9) target bundleno = 40 (0x28), region = 77  ;;  %vm229_vm0 = vcmask (!%p434_p9), 261120   ;;  %v591_v2 = vmov (!%p434_p9), 0.0  }
  0x22   : > { %230 = vst.msk [vmem:[#allocation2] sm:$0xff] (!%p434_p9), %vm229_vm0, %v591_v2  ;;  %231 = vst.msk [vmem:[#allocation2 + $0x8] sm:$0xff] (!%p434_p9), %vm229_vm0, %v591_v2 }
  0x28 PF: > { %v443_v3 = vld [vmem:[%s208_s4] sm:$0xff]   ;;  %vm242_vm1 = vcmask 261120   ;;  %p435_p10 = scmp.ne.s32.totalorder %s581_s14, 1 }
  0x29   : > { %v236_v4 = vld [vmem:[#allocation2] sm:$0xff]  ;;  %v237_v5 = vld [vmem:[#allocation2 + $0x8] sm:$0xff]  ;;  %v444_v6 = vunpack.c.l.bf16 %v443_v3  ;;  %v445_v7 = vunpack.c.h.bf16 %v443_v3  ;;  %v269_v12 = vld [vmem:[%s729_s1 + $0x10] sm:$0xff] (!%p435_p10)  ;;  %v592_v13 = vmov (!%p435_p10), 0.0|0.0   ;;  %vm593_vm2 = vmmov (!%p435_p10), 0  }
  0x2a   : > { %248 = sbr.rel (%p435_p10) target bundleno = 301 (0x12d), region = 81  ;;  %v267_v10 = vld [vmem:[%s729_s1] sm:$0xff] (!%p435_p10)  ;;  %v268_v11 = vld [vmem:[%s729_s1 + $0x8] sm:$0xff] (!%p435_p10)  ;;  %462 = vmatprep.subr.bf16.mxu0 (!%p435_p10), %v592_v13  ;;  %v270_v15 = vld [vmem:[%s729_s1 + $0x18] sm:$0xff] (!%p435_p10)  ;;  %v594_v16 = vmov (!%p435_p10), 0.0   ;;  %vm280_vm3 = vcmask (!%p435_p10), 1041409  }
  0x2b   : > { %v240_v8 = vadd.f32 %v444_v6, %v236_v4  ;;  %v241_v9 = vadd.f32 %v445_v7, %v237_v5  ;;  %v463_v14 = vpack.c.bf16 (!%p435_p10), %v268_v11, %v267_v10  ;;  %459 = vmatprep.mubr.msk.f32.mxu0 (!%p435_p10), %vm593_vm2, %v594_v16  ;;  %v466_v21 = vpack.c.bf16 (!%p435_p10), %v270_v15, %v269_v12  ;;  %v436_v37 = vld [vmem:[%s730_s2] ss:$0 sm:$0xff] (!%p435_p10) }
  0x2d   : > { %243 = vst.msk [vmem:[#allocation2] sm:$0xff] %vm242_vm1, %v240_v8  ;;  %244 = vst.msk [vmem:[#allocation2 + $0x8] sm:$0xff] %vm242_vm1, %v241_v9  ;;  %464 = vmatpush3.bf16.msra.mxu0 (!%p435_p10), %v463_v14 }
  0x2e   : > { %465 = vmatprep.subr.bf16.mxu0 (!%p435_p10), %v592_v13 }
  0x31   : > { %467 = vmatpush3.bf16.msra.mxu0 %v466_v21 }
  0x34   : > { %v249_v17 = vld [vmem:[#allocation2] sm:$0xff]  ;;  %v250_v18 = vld [vmem:[#allocation2 + $0x8] sm:$0xff] }
  0x35   : > { %v251_v19 = vsel %vm242_vm1, %v249_v17, 0.0  ;;  %v258_v20 = vsel %vm242_vm1, %v250_v18, 0.0 }
  0x36   : > { %v252_v22 = vrot.slane %v251_v19, 4  ;;  %v259_v23 = vrot.slane %v258_v20, 4 }
  0x38   : > { %v253_v24 = vadd.f32 %v252_v22, %v251_v19  ;;  %v260_v25 = vadd.f32 %v259_v23, %v258_v20 }
  0x3a   : > { %v254_v26 = vrot.slane %v253_v24, 2  ;;  %v261_v27 = vrot.slane %v260_v25, 2 }
  0x3c   : > { %v255_v28 = vadd.f32 %v254_v26, %v253_v24  ;;  %v262_v29 = vadd.f32 %v261_v27, %v260_v25 }
  0x3e   : > { %v256_v30 = vrot.slane %v255_v28, 1  ;;  %v263_v31 = vrot.slane %v262_v29, 1 }
  0x40   : > { %v257_v32 = vadd.f32 %v256_v30, %v255_v28  ;;  %v264_v33 = vadd.f32 %v263_v31, %v262_v29 }
  0x42   : > { %v265_v34 = vmul.f32 0.0625, %v257_v32  ;;  %v266_v35 = vmul.f32 0.0625, %v264_v33 }
  0x44   : > { %v281_v36 = vsel %vm280_vm3, %v266_v35, %v265_v34 }
  0x45   : > { %460 = vmatmul.mubr.msk.f32.vlgmr.msra.gmra.mrb[0].mxu0 %vm242_vm1, %v281_v36 }
 0x118   : > { %v350_v38 = vpop.f32.mrb[0].mxu0 }
 0x119   : > { %v351_v39 = vadd.f32 %v436_v37, %v350_v38  ;;  %v461_v40 = vpop.f32.mrb[1].mxu0 }
 0x11b   : > { %v355_v41 = vmul.f32 0.70710677, %v351_v39  ;;  %v354_v43 = vmul.f32 0.5, %v351_v39 }
 0x11d   : > { %519 = verf.f32 %v355_v41 }
 0x127   : > { %v520_v42 = vpop.eup %519 }
 0x128   : > { %v357_v44 = vadd.f32 1.0, %v520_v42 }
 0x12a   : > { %v358_v45 = vmul.f32 %v357_v44, %v354_v43 }
 0x12c   : > { %359 = vst [vmem:[#allocation4] sm:$0x3] %v358_v45 }
 0x12d PF: > { %p687_p11 = scmp.eq.s32.totalorder %s427_s17, 1  ;;  %s595_s22 = smov [#allocation4]  }
 0x12e   : > { %s369_s23 = sshll.u32 %s595_s22, 4  ;;  %s370_s23 = int_to_ptr.vmem [resolvable:$true] %s369_s23 }
 0x12f   : > { %s521_s24 = scalar_lea.vmem %s370_s23, 32  ;;  %p528_p1 = scmp.lt.s32.totalorder %s370_s23, %s370_s23 }
 0x130   : > { %p522_p12 = scmp.ne.s32.totalorder %s370_s23, %s521_s24  ;;  %p529_p2 = scmp.lt.s32.totalorder %s521_s24, %s521_s24 }
 0x132   : > { %p523_p13 = pnand %p522_p12, %p687_p11  ;;  %p530_p3 = por %p529_p2, %p528_p1 }
 0x134   : > { %p524_p0 = pneg %p523_p13 }
 0x136   : > { %p531_p4 = pnand %p530_p3, %p524_p0 }
 0x138   : > { %534 = shalt.err (!%p531_p4)
}
 0x139   : > { %s535_s17 = scalar_lea.hbm %s731_s3, 32 }
 0x13a   : > { %p536_p5 = scmp.ne.s32.totalorder %s731_s3, %s535_s17  ;;  %p541_p8 = scmp.lt.u32.totalorder %s535_s17, %s731_s3 }
 0x13c   : > { %p537_p6 = pnand %p536_p5, %p687_p11 }
 0x13e   : > { %p538_p7 = pneg %p537_p6 }
 0x140   : > { %p543_p9 = pnand %p541_p8, %p538_p7 }
 0x142   : > { %546 = shalt.err (!%p543_p9)
}
 0x143   : > { %469 = dma.vmem_to_hbm [thread:$0]  (%p687_p11), %s370_s23, 32, %s731_s3, [#allocation5]  }
 0x144   : > { %568 = dma.done.wait (%p687_p11), [#allocation5], 32  }
 0x145   : > { %570 = vsyncadd (%p687_p11), [#allocation5], 4294967264 }
 0x146 PF: > { %s14_s16 = sadd.s32 1, %s589_s16   ;;  %s733_s12 = smov %s577_s13 }
 0x147   : > { %p11_p10 = scmp.ge.s32.totalorder %s14_s16, 4   ;;  %s734_s13 = smov %s652_s21 }
 0x148   : > { %s735_s14 = smov %s585_s15  ;;  %s736_s15 = smov %s738_s18 }
 0x149   :  { %13 = sbr.rel (!%p11_p10) target bundleno = 3 (0x3), region = 114 }
 0x150   :  { %382 = vsyncpa [#allocation5], 1 }
 0x151   :  { %384 = vsyncpa [#allocation5 + $0x1], 1 }

</bundles_post_ra>
